<compile_context>
chip_gen: v7x
topology: tpu7x:2x2x1
jax: 0.10.0
libtpu: 0.0.40
codegen_flags: <defaults>
</compile_context>

<pallas_src>
import functools

import jax
import jax.numpy as jnp
from jax.experimental import pallas as pl
from jax.experimental.pallas import tpu as pltpu


def _ceil_to(x: int, d: int) -> int:
    if d <= 0:
        return x
    return ((x + d - 1) // d) * d


def _vmem_capacity_bytes() -> int:
    """Per-core VMEM capacity (128 MiB on v5e/v6e, 64 MiB on v7x)."""
    try:
        info = pltpu.get_tpu_info()
        return int(getattr(info, "vmem_capacity_bytes", 128 << 20))
    except Exception:
        return 128 << 20


def _norm_pad_kernel(mean_ref, inv_std_ref, x_ref, o_ref, *,
                     H, W, TH, C_blk, pad_value, mask_rows):
    # x_ref : (1, C_blk, TH, W)   input block (rows >= H are undefined -> masked out
    #                             when Hp > H; when Hp == H any undefined rows in a
    #                             partial last block are dropped by the partial-block
    #                             output write-back, so no mask is needed there)
    # o_ref : (1, C_blk, TH, Wp)  output block
    Wp = o_ref.shape[-1]
    c0 = pl.program_id(1) * C_blk
    pad = jnp.float32(pad_value)

    if mask_rows:  # static: only emitted when Hp > H
        h0 = pl.program_id(2) * TH
        # (TH, 1) column mask; broadcasts along lanes inside the select below.
        row = h0 + jax.lax.broadcasted_iota(jnp.int32, (TH, 1), 0)
        row_ok = row < H

    for ci in range(C_blk):  # static unroll over channels in this block
        m = mean_ref[c0 + ci]          # SMEM scalar
        inv_s = inv_std_ref[c0 + ci]   # SMEM scalar (precomputed 1/std)
        xn = (x_ref[0, ci].astype(jnp.float32) - m) * inv_s
        if mask_rows:
            xn = jnp.where(row_ok, xn, pad)
        # Valid region written exactly once.
        o_ref[0, ci, :, :W] = xn.astype(o_ref.dtype)

    if W < Wp:  # static: right pad strip, written exactly once
        o_ref[0, :, :, W:] = jnp.full((C_blk, TH, Wp - W), pad_value, o_ref.dtype)


def multispectral_preprocess(
    inputs: jax.Array,              # (N, C, H, W)
    mean=None,                      # (C,) or None
    std=None,                       # (C,) or None
    *,
    pad_size_divisor: int = 32,
    pad_value: float = 0.0,
    fold_channels=None,             # None = auto
):
    """Pallas equivalent of MultiSpectralDetDataPreprocessor tensor path."""
    N, C, H, W = inputs.shape
    Hp = _ceil_to(H, pad_size_divisor)
    Wp = _ceil_to(W, pad_size_divisor)

    if mean is None:
        mean = jnp.zeros((C,), jnp.float32)
    if std is None:
        std = jnp.ones((C,), jnp.float32)
    mean = jnp.asarray(mean, jnp.float32).reshape(C)
    inv_std = (1.0 / jnp.asarray(std, jnp.float32)).reshape(C)

    # Match torch's promotion of (x - float_mean) / float_std.
    out_dtype = jnp.promote_types(inputs.dtype, jnp.float32)
    in_itemsize = jnp.dtype(inputs.dtype).itemsize
    out_itemsize = jnp.dtype(out_dtype).itemsize

    # ---- generation-aware VMEM budgeting ------------------------------------
    vmem_cap = _vmem_capacity_bytes()
    vmem_limit = int(min(vmem_cap // 2, 48 << 20))   # 48 MiB v5e/v6e, 32 MiB v7x
    # Per-block (input + output) byte budget: double-buffered blocks plus the
    # compiler's f32 / xn temporaries must stay well under the scoped limit.
    budget_blk = int(0.7 * vmem_limit) // 3

    # ---- tiling decisions ----------------------------------------------------
    row_io_bytes = W * in_itemsize + Wp * out_itemsize   # one row, one channel
    if fold_channels is None:
        # Fold all channels into one block when C is small or when a minimal
        # (C, 32, Wp) block still fits the budget: C x fewer grid steps, larger DMAs.
        fold_channels = (C <= 8) or (C * 32 * row_io_bytes <= budget_blk)
    C_blk = C if fold_channels else 1

    # Rows per block: as many as fit the budget, multiple of 32 so packed
    # sub-32-bit input dtypes (uint8 / bf16) stay sublane-tile aligned.
    TH = budget_blk // max(1, C_blk * row_io_bytes)
    TH = (TH // 32) * 32
    TH = max(32, min(2048, TH))
    TH = min(Hp, TH)
    grid_h = pl.cdiv(Hp, TH)

    # Keep enough grid steps for megacore sharding (v7x: 2 TCs) and for the
    # double-buffered pipeline when N is small and channels are folded.
    steps_nc = N * (C // C_blk)
    if steps_nc * grid_h < 8 and Hp > 32 and TH > 32:
        want_h = min(pl.cdiv(8, steps_nc), pl.cdiv(Hp, 32))
        TH_new = _ceil_to(pl.cdiv(Hp, want_h), 32)
        TH = max(32, min(TH, TH_new))
        grid_h = pl.cdiv(Hp, TH)

    grid = (N, C // C_blk, grid_h)

    # Last input H-block that contains any valid row (clamp fully-padded tiles).
    h_max_in = (H - 1) // TH

    # Safety for pathologically wide rows: make sure the pipeline buffers fit.
    blk_bytes = C_blk * TH * row_io_bytes
    vmem_limit = int(min(vmem_cap // 2, max(vmem_limit, 3 * blk_bytes + (4 << 20))))

    kernel = functools.partial(
        _norm_pad_kernel, H=H, W=W, TH=TH, C_blk=C_blk,
        pad_value=float(pad_value), mask_rows=(Hp != H))

    out = pl.pallas_call(
        kernel,
        out_shape=jax.ShapeDtypeStruct((N, C, Hp, Wp), out_dtype),
        grid=grid,
        in_specs=[
            pl.BlockSpec(memory_space=pltpu.SMEM),   # mean  (C,)
            pl.BlockSpec(memory_space=pltpu.SMEM),   # 1/std (C,)
            pl.BlockSpec((1, C_blk, TH, W),
                         lambda n, c, h: (n, c, jnp.minimum(h, h_max_in), 0)),
        ],
        out_specs=pl.BlockSpec((1, C_blk, TH, Wp),
                               lambda n, c, h: (n, c, h, 0)),
        compiler_params=pltpu.CompilerParams(
            dimension_semantics=("parallel", "parallel", "parallel"),
            vmem_limit_bytes=vmem_limit),
    )(mean, inv_std, inputs)

    # Metadata that forward() attaches to data_samples (python-side only).
    meta = {
        "batch_input_shape": (Hp, Wp),   # tuple(inputs[0].size()[-2:]) after pad
        "pad_shape": [(H, W)] * N,       # _get_pad_shape
    }
    # TODO(synk): boxtype2tensor / pad_gt_masks / pad_gt_sem_seg operate on mmdet
    # DataSample python objects and have no tensor-kernel equivalent.
    return {"inputs": out, "meta": meta}


def _reference(inputs, mean, std, pad_size_divisor, pad_value):
    N, C, H, W = inputs.shape
    Hp = _ceil_to(H, pad_size_divisor)
    Wp = _ceil_to(W, pad_size_divisor)
    norm = (inputs.astype(jnp.float32) - mean[None, :, None, None]) / std[None, :, None, None]
    return jnp.pad(
        norm,
        ((0, 0), (0, 0), (0, Hp - H), (0, Wp - W)),
        mode="constant",
        constant_values=pad_value,
    )


if __name__ == "__main__":
    key = jax.random.PRNGKey(0)
    mean = jnp.array([123.675, 116.28, 103.53, 110.0], dtype=jnp.float32)
    std = jnp.array([58.395, 57.12, 57.375, 57.0], dtype=jnp.float32)

    cases = [
        # (N, C, H,  W,   divisor, pad_value, fold_channels, dtype)
        (2, 4, 16, 16,  32, 0.0, None,  jnp.float32),   # aligned small case (folded C)
        (2, 4, 20, 44,  32, 1.5, None,  jnp.float32),   # unaligned H/W, nonzero pad
        (2, 4, 20, 44,  32, 1.5, False, jnp.float32),   # same shapes, per-channel path
        (1, 3, 32, 100, 32, 2.0, None,  jnp.uint8),     # packed input dtype + W pad
    ]
    for idx, (N, C, H, W, d, pv, fold, dt) in enumerate(cases):
        key, k = jax.random.split(key)
        if dt == jnp.uint8:
            x = jax.random.randint(k, (N, C, H, W), 0, 256, dtype=jnp.int32).astype(jnp.uint8)
        else:
            x = jax.random.uniform(k, (N, C, H, W), dtype=dt) * 255.0
        m, s = mean[:C], std[:C]
        res = multispectral_preprocess(
            x, m, s, pad_size_divisor=d, pad_value=pv, fold_channels=fold)
        out = jax.block_until_ready(res["inputs"])
        ref = _reference(x, m, s, d, pv)
        assert out.shape == ref.shape, (idx, out.shape, ref.shape)
        assert jnp.allclose(out, ref, atol=1e-4, rtol=1e-5), f"case {idx} mismatch"
        assert res["meta"]["batch_input_shape"] == ref.shape[-2:]

    print("KERNEL_OK")
</pallas_src>

<mosaic_0001>
module attributes {stable_mosaic.version = 11 : i64} {
  func.func @_norm_pad_kernel(%arg0: i32, %arg1: i32, %arg2: i32, %arg3: memref<4xf32, #tpu.memory_space<smem>>, %arg4: memref<4xf32, #tpu.memory_space<smem>>, %arg5: memref<1x4x32x16xf32, #tpu.memory_space<vmem>>, %arg6: memref<1x4x32x32xf32, #tpu.memory_space<vmem>>) attributes {dimension_semantics = [#tpu.dimension_semantics<parallel>, #tpu.dimension_semantics<parallel>, #tpu.dimension_semantics<parallel>], iteration_bounds = array<i64: 2, 1, 1>, scalar_prefetch = 0 : i64, scratch_operands = 0 : i64, tpu.core_type = #tpu.core_type<tc>, window_params = [{transform_indices = @transform_0, window_bounds = array<i64: 4>}, {transform_indices = @transform_1, window_bounds = array<i64: 4>}, {transform_indices = @transform_2, window_bounds = array<i64: 1, 4, 32, 16>}, {transform_indices = @transform_3, window_bounds = array<i64: 1, 4, 32, 32>}]} {
    %c4_i32 = arith.constant 4 : i32
    %0 = arith.muli %arg1, %c4_i32 : i32
    %c32_i32 = arith.constant 32 : i32
    %1 = arith.muli %arg2, %c32_i32 : i32
    %2 = tpu.iota {dimensions = array<i32: 0>} : vector<32x1xi32>
    %3 = vector.broadcast %1 : i32 to vector<32x1xi32>
    %4 = arith.addi %3, %2 : vector<32x1xi32>
    %c16_i32 = arith.constant 16 : i32
    %5 = vector.broadcast %c16_i32 : i32 to vector<32x1xi32>
    %6 = arith.cmpi slt, %4, %5 : vector<32x1xi32>
    %c0_i32 = arith.constant 0 : i32
    %7 = arith.addi %0, %c0_i32 : i32
    %8 = arith.index_cast %7 : i32 to index
    %9 = memref.load %arg3[%8] : memref<4xf32, #tpu.memory_space<smem>>
    %c0_i32_0 = arith.constant 0 : i32
    %10 = arith.addi %0, %c0_i32_0 : i32
    %11 = arith.index_cast %10 : i32 to index
    %12 = memref.load %arg4[%11] : memref<4xf32, #tpu.memory_space<smem>>
    %c0 = arith.constant 0 : index
    %c0_1 = arith.constant 0 : index
    %c0_2 = arith.constant 0 : index
    %c0_3 = arith.constant 0 : index
    %13 = vector.load %arg5[%c0, %c0_1, %c0_2, %c0_3] : memref<1x4x32x16xf32, #tpu.memory_space<vmem>>, vector<1x1x32x16xf32>
    %14 = vector.shape_cast %13 : vector<1x1x32x16xf32> to vector<32x16xf32>
    %15 = vector.broadcast %9 : f32 to vector<32x16xf32>
    %16 = arith.subf %14, %15 : vector<32x16xf32>
    %17 = vector.broadcast %12 : f32 to vector<32x16xf32>
    %18 = arith.mulf %16, %17 : vector<32x16xf32>
    %cst = arith.constant 0.000000e+00 : f32
    %19 = vector.shape_cast %6 : vector<32x1xi1> to vector<32x1xi1>
    %20 = vector.broadcast %19 : vector<32x1xi1> to vector<32x16xi1>
    %21 = vector.broadcast %cst : f32 to vector<32x16xf32>
    %22 = arith.select %20, %18, %21 : vector<32x16xi1>, vector<32x16xf32>
    %c0_4 = arith.constant 0 : index
    %c0_5 = arith.constant 0 : index
    %c0_6 = arith.constant 0 : index
    %c0_7 = arith.constant 0 : index
    %23 = vector.load %arg6[%c0_4, %c0_5, %c0_6, %c0_7] : memref<1x4x32x32xf32, #tpu.memory_space<vmem>>, vector<1x1x32x16xf32>
    %24 = vector.shape_cast %23 : vector<1x1x32x16xf32> to vector<32x16xf32>
    %25 = vector.shape_cast %22 : vector<32x16xf32> to vector<1x1x32x16xf32>
    tpu.vector_store %arg6[%c0_4, %c0_5, %c0_6, %c0_7], %25 {strides = array<i32>} : memref<1x4x32x32xf32, #tpu.memory_space<vmem>>, vector<1x1x32x16xf32>,
    %c1_i32 = arith.constant 1 : i32
    %26 = arith.addi %0, %c1_i32 : i32
    %27 = arith.index_cast %26 : i32 to index
    %28 = memref.load %arg3[%27] : memref<4xf32, #tpu.memory_space<smem>>
    %c1_i32_8 = arith.constant 1 : i32
    %29 = arith.addi %0, %c1_i32_8 : i32
    %30 = arith.index_cast %29 : i32 to index
    %31 = memref.load %arg4[%30] : memref<4xf32, #tpu.memory_space<smem>>
    %c0_9 = arith.constant 0 : index
    %c1 = arith.constant 1 : index
    %c0_10 = arith.constant 0 : index
    %c0_11 = arith.constant 0 : index
    %32 = vector.load %arg5[%c0_9, %c1, %c0_10, %c0_11] : memref<1x4x32x16xf32, #tpu.memory_space<vmem>>, vector<1x1x32x16xf32>
    %33 = vector.shape_cast %32 : vector<1x1x32x16xf32> to vector<32x16xf32>
    %34 = vector.broadcast %28 : f32 to vector<32x16xf32>
    %35 = arith.subf %33, %34 : vector<32x16xf32>
    %36 = vector.broadcast %31 : f32 to vector<32x16xf32>
    %37 = arith.mulf %35, %36 : vector<32x16xf32>
    %cst_12 = arith.constant 0.000000e+00 : f32
    %38 = vector.shape_cast %6 : vector<32x1xi1> to vector<32x1xi1>
    %39 = vector.broadcast %38 : vector<32x1xi1> to vector<32x16xi1>
    %40 = vector.broadcast %cst_12 : f32 to vector<32x16xf32>
    %41 = arith.select %39, %37, %40 : vector<32x16xi1>, vector<32x16xf32>
    %c0_13 = arith.constant 0 : index
    %c1_14 = arith.constant 1 : index
    %c0_15 = arith.constant 0 : index
    %c0_16 = arith.constant 0 : index
    %42 = vector.load %arg6[%c0_13, %c1_14, %c0_15, %c0_16] : memref<1x4x32x32xf32, #tpu.memory_space<vmem>>, vector<1x1x32x16xf32>
    %43 = vector.shape_cast %42 : vector<1x1x32x16xf32> to vector<32x16xf32>
    %44 = vector.shape_cast %41 : vector<32x16xf32> to vector<1x1x32x16xf32>
    tpu.vector_store %arg6[%c0_13, %c1_14, %c0_15, %c0_16], %44 {strides = array<i32>} : memref<1x4x32x32xf32, #tpu.memory_space<vmem>>, vector<1x1x32x16xf32>,
    %c2_i32 = arith.constant 2 : i32
    %45 = arith.addi %0, %c2_i32 : i32
    %46 = arith.index_cast %45 : i32 to index
    %47 = memref.load %arg3[%46] : memref<4xf32, #tpu.memory_space<smem>>
    %c2_i32_17 = arith.constant 2 : i32
    %48 = arith.addi %0, %c2_i32_17 : i32
    %49 = arith.index_cast %48 : i32 to index
    %50 = memref.load %arg4[%49] : memref<4xf32, #tpu.memory_space<smem>>
    %c0_18 = arith.constant 0 : index
    %c2 = arith.constant 2 : index
    %c0_19 = arith.constant 0 : index
    %c0_20 = arith.constant 0 : index
    %51 = vector.load %arg5[%c0_18, %c2, %c0_19, %c0_20] : memref<1x4x32x16xf32, #tpu.memory_space<vmem>>, vector<1x1x32x16xf32>
    %52 = vector.shape_cast %51 : vector<1x1x32x16xf32> to vector<32x16xf32>
    %53 = vector.broadcast %47 : f32 to vector<32x16xf32>
    %54 = arith.subf %52, %53 : vector<32x16xf32>
    %55 = vector.broadcast %50 : f32 to vector<32x16xf32>
    %56 = arith.mulf %54, %55 : vector<32x16xf32>
    %cst_21 = arith.constant 0.000000e+00 : f32
    %57 = vector.shape_cast %6 : vector<32x1xi1> to vector<32x1xi1>
    %58 = vector.broadcast %57 : vector<32x1xi1> to vector<32x16xi1>
    %59 = vector.broadcast %cst_21 : f32 to vector<32x16xf32>
    %60 = arith.select %58, %56, %59 : vector<32x16xi1>, vector<32x16xf32>
    %c0_22 = arith.constant 0 : index
    %c2_23 = arith.constant 2 : index
    %c0_24 = arith.constant 0 : index
    %c0_25 = arith.constant 0 : index
    %61 = vector.load %arg6[%c0_22, %c2_23, %c0_24, %c0_25] : memref<1x4x32x32xf32, #tpu.memory_space<vmem>>, vector<1x1x32x16xf32>
    %62 = vector.shape_cast %61 : vector<1x1x32x16xf32> to vector<32x16xf32>
    %63 = vector.shape_cast %60 : vector<32x16xf32> to vector<1x1x32x16xf32>
    tpu.vector_store %arg6[%c0_22, %c2_23, %c0_24, %c0_25], %63 {strides = array<i32>} : memref<1x4x32x32xf32, #tpu.memory_space<vmem>>, vector<1x1x32x16xf32>,
    %c3_i32 = arith.constant 3 : i32
    %64 = arith.addi %0, %c3_i32 : i32
    %65 = arith.index_cast %64 : i32 to index
    %66 = memref.load %arg3[%65] : memref<4xf32, #tpu.memory_space<smem>>
    %c3_i32_26 = arith.constant 3 : i32
    %67 = arith.addi %0, %c3_i32_26 : i32
    %68 = arith.index_cast %67 : i32 to index
    %69 = memref.load %arg4[%68] : memref<4xf32, #tpu.memory_space<smem>>
    %c0_27 = arith.constant 0 : index
    %c3 = arith.constant 3 : index
    %c0_28 = arith.constant 0 : index
    %c0_29 = arith.constant 0 : index
    %70 = vector.load %arg5[%c0_27, %c3, %c0_28, %c0_29] : memref<1x4x32x16xf32, #tpu.memory_space<vmem>>, vector<1x1x32x16xf32>
    %71 = vector.shape_cast %70 : vector<1x1x32x16xf32> to vector<32x16xf32>
    %72 = vector.broadcast %66 : f32 to vector<32x16xf32>
    %73 = arith.subf %71, %72 : vector<32x16xf32>
    %74 = vector.broadcast %69 : f32 to vector<32x16xf32>
    %75 = arith.mulf %73, %74 : vector<32x16xf32>
    %cst_30 = arith.constant 0.000000e+00 : f32
    %76 = vector.shape_cast %6 : vector<32x1xi1> to vector<32x1xi1>
    %77 = vector.broadcast %76 : vector<32x1xi1> to vector<32x16xi1>
    %78 = vector.broadcast %cst_30 : f32 to vector<32x16xf32>
    %79 = arith.select %77, %75, %78 : vector<32x16xi1>, vector<32x16xf32>
    %c0_31 = arith.constant 0 : index
    %c3_32 = arith.constant 3 : index
    %c0_33 = arith.constant 0 : index
    %c0_34 = arith.constant 0 : index
    %80 = vector.load %arg6[%c0_31, %c3_32, %c0_33, %c0_34] : memref<1x4x32x32xf32, #tpu.memory_space<vmem>>, vector<1x1x32x16xf32>
    %81 = vector.shape_cast %80 : vector<1x1x32x16xf32> to vector<32x16xf32>
    %82 = vector.shape_cast %79 : vector<32x16xf32> to vector<1x1x32x16xf32>
    tpu.vector_store %arg6[%c0_31, %c3_32, %c0_33, %c0_34], %82 {strides = array<i32>} : memref<1x4x32x32xf32, #tpu.memory_space<vmem>>, vector<1x1x32x16xf32>,
    %cst_35 = arith.constant 0.000000e+00 : f32
    %83 = vector.broadcast %cst_35 : f32 to vector<4x32x16xf32>
    %c0_36 = arith.constant 0 : index
    %c0_37 = arith.constant 0 : index
    %c0_38 = arith.constant 0 : index
    %c16 = arith.constant 16 : index
    %84 = vector.load %arg6[%c0_36, %c0_37, %c0_38, %c16] : memref<1x4x32x32xf32, #tpu.memory_space<vmem>>, vector<1x4x32x16xf32>
    %85 = vector.shape_cast %84 : vector<1x4x32x16xf32> to vector<4x32x16xf32>
    %86 = vector.shape_cast %83 : vector<4x32x16xf32> to vector<1x4x32x16xf32>
    tpu.vector_store %arg6[%c0_36, %c0_37, %c0_38, %c16], %86 {strides = array<i32>} : memref<1x4x32x32xf32, #tpu.memory_space<vmem>>, vector<1x4x32x16xf32>,
    return
  }
  func.func @transform_0(%arg0: i32, %arg1: i32, %arg2: i32) -> i32 {
    %c0_i32 = arith.constant 0 : i32
    %c0_i32_0 = arith.constant 0 : i32
    return %c0_i32 : i32
  }
  func.func @transform_1(%arg0: i32, %arg1: i32, %arg2: i32) -> i32 {
    %c0_i32 = arith.constant 0 : i32
    %c0_i32_0 = arith.constant 0 : i32
    return %c0_i32 : i32
  }
  func.func @transform_2(%arg0: i32, %arg1: i32, %arg2: i32) -> (i32, i32, i32, i32) {
    %c0_i32 = arith.constant 0 : i32
    %0 = arith.minsi %arg2, %c0_i32 : i32
    %c0_i32_0 = arith.constant 0 : i32
    %c0_i32_1 = arith.constant 0 : i32
    return %arg0, %arg1, %0, %c0_i32_0 : i32, i32, i32, i32
  }
  func.func @transform_3(%arg0: i32, %arg1: i32, %arg2: i32) -> (i32, i32, i32, i32) {
    %c0_i32 = arith.constant 0 : i32
    %c0_i32_0 = arith.constant 0 : i32
    return %arg0, %arg1, %arg2, %c0_i32 : i32, i32, i32, i32
  }
}

</mosaic_0001>

<bundles_post_ra>
// kernel: tpu_custom_call.1
= control target key start
LH: loop header
LB: loop body
LE: loop exit
PB: predicated region body
PF: predicated region fallthrough
CT: control target
= control target key end

     0   :  { %s1177_s0 = inlined_call_operand.hbm [shape: f32[4], index: 0, kind: input, shape index: {}]   ;;  %s1178_s1 = inlined_call_operand.vmem [shape: f32[4], index: 1, kind: input, shape index: {}]   ;;  %s1179_s2 = inlined_call_operand.hbm [shape: f32[2,4,16,16], index: 2, kind: input, shape index: {}]   ;;  %s1180_s3 = inlined_call_operand.hbm [shape: f32[2,4,32,32], index: 3, kind: output, shape index: {}]  }
   0x1   :  { %1185 = sst [smem:[#allocation16_spill]] %s1177_s0 }
   0x2   :  { %1186 = sst [smem:[#allocation17_spill]] %s1178_s1 }
   0x3   :  { %8 = vsyncpa [#allocation5], 0 }
   0x4   :  { %9 = vsyncpa [#allocation6], 0 }
   0x5   :  { %10 = vsyncpa [#allocation3], 0 }
   0x6   :  { %12 = vsyncpa [#allocation3 + $0x1], 0 }
   0x7   :  { %13 = vsyncpa [#allocation4], 0 }
   0x8   :  { %15 = vsyncpa [#allocation4 + $0x1], 0  ;;  %s865_s12 = smov 0   ;;  %s867_s13 = smov 0  }
   0x9   :  { %s869_s14 = smov 0   ;;  %s871_s15 = smov 0  }
   0xa   :  { %s873_s16 = smov 0   ;;  %s875_s17 = smov 0  }
   0xb LB: > { %s574_s18 = sadd.s32 4294967295, %s831_s17   ;;  %s575_s19 = sadd.s32 4294967294, %s831_s17   ;;  %s831_s17 = sphi %s875_s17, %s21_s17   ;;  %s827_s16 = sphi %s873_s16, %s1204_s16   ;;  %s823_s15 = sphi %s871_s15, %s1203_s15   ;;  %s819_s14 = sphi %s869_s14, %s1202_s14   ;;  %s815_s13 = sphi %s867_s13, %s1201_s13   ;;  %s811_s12 = sphi %s865_s12, %s1200_s12  }
   0xc   : > { %s40_s20 = sadd.s32 1, %s827_s16  ;;  %s97_s21 = sadd.s32 1, %s819_s14 }
   0xd   : > { %p42_p0 = scmp.ge.s32.totalorder %s40_s20, 2  ;;  %p104_p1 = scmp.ne.s32.totalorder %s819_s14, %s815_s13 }
   0xe   : > { %p105_p2 = scmp.eq.s32.totalorder %s831_s17, 0  ;;  %p110_p3 = scmp.ne.s32.totalorder %s815_s13, %s811_s12 }
   0xf   : > { %s1206_s20 = smov (%p42_p0, %s40_s20), 0  ;;  %p910_p5 = scmp.eq.s32.totalorder %s574_s18, 0 }
  0x10   : > { %p906_p4 = por %p105_p2, %p104_p1  ;;  %s90_s24 = ssub.s32 %s827_s16, %s1206_s20 }
  0x11   : > { %s1188_s23 = scalar_select %p910_p5, 1, 0 }
  0x12   : > { %p138_p6 = scmp.eq.s32.totalorder %s574_s18, 1  ;;  %p95_p7 = scmp.eq.s32.totalorder %s90_s24, 0 }
  0x13   : > { %p918_p8 = por %p910_p5, %p110_p3  ;;  %p144_p10 = scmp.eq.s32.totalorder %s575_s19, 1 }
  0x14   : > { %p922_p9 = por %p138_p6, %p104_p1  ;;  %p576_p12 = scmp.ge.s32.totalorder %s831_s17, 1 }
  0x15   : > { %s1189_s25 = scalar_select %p918_p8, 1, 0 }
  0x16   : > { %s1190_s26 = scalar_select %p922_p9, 1, 0 }
  0x17   : > { %s927_s27 = scalar_select %p95_p7, %s819_s14, %s97_s21  }
  0x18   : > { %p929_p11 = por %p144_p10, %p110_p3  ;;  %p151_p13 = scmp.lt.s32.totalorder %s831_s17, 3 }
  0x19   : > { %s1193_s1 = sld [smem:[#allocation17_spill]]  ;;  %s1195_s0 = sld [smem:[#allocation16_spill]] }
  0x1a   : > { %s1191_s28 = scalar_select %p929_p11, 1, 0 }
  0x1b   : > { %p935_p0 = pnand %p576_p12, %p151_p13 }
  0x1d   : > { %p638_p2 = pneg %p935_p0 }
  0x1f   : > { %s173_s5 = sshll.u32 %s1193_s1, 4  ;;  %p946_p1 = pnand %p638_p2, %p910_p5  ;;  %s174_s5 = int_to_ptr.vmem [resolvable:$true] %s173_s5 }
  0x20   : > { %s713_s9 = scalar_lea.hbm %s1195_s0, 16 }
  0x21   : > { %p714_p3 = scmp.ne.s32.totalorder %s1195_s0, %s713_s9  ;;  %p715_p6 = pneg %p946_p1 }
  0x22   : > { %p720_p12 = scmp.lt.u32.totalorder %s713_s9, %s1195_s0 }
  0x23   : > { %p716_p7 = pnand %p715_p6, %p714_p3 }
  0x25   : > { %p717_p10 = pneg %p716_p7 }
  0x27   : > { %p722_p13 = pnand %p720_p12, %p717_p10 }
  0x29   : > { %725 = shalt.err (!%p722_p13)
}
  0x2a   : > { %s833_s21 = smov [#allocation2]   ;;  %s726_s4 = scalar_lea.vmem %s174_s5, 16 }
  0x2b   : > { %641 = dma.hbm_to_smem (!%p946_p1), %s1195_s0, 16, %s833_s21, [#allocation5]  }
  0x2c   : > { %p727_p2 = scmp.ne.s32.totalorder %s174_s5, %s726_s4  ;;  %p734_p8 = scmp.lt.s32.totalorder %s174_s5, %s174_s5 }
  0x2d   : > { %p735_p3 = scmp.lt.s32.totalorder %s726_s4, %s726_s4 }
  0x2e   : > { %p729_p11 = pnand %p727_p2, %p715_p6 }
  0x2f   : > { %p736_p7 = por %p735_p3, %p734_p8 }
  0x30   : > { %p730_p9 = pneg %p729_p11 }
  0x32   : > { %p737_p5 = pnand %p736_p7, %p730_p9 }
  0x34   : > { %740 = shalt.err (!%p737_p5)
}
  0x35   : > { %s834_s7 = smov [#allocation7]   ;;  %p579_p10 = scmp.ge.s32.totalorder %s831_s17, 2 }
  0x36   : > { %644 = dma.vmem_to_smem (!%p946_p1), %s174_s5, 16, %s834_s7, [#allocation6]  }
  0x37   : > { %180 = sbr.rel (%p579_p10) target bundleno = 82 (0x52), region = 24 }
  0x3e   : > { %183 = sbr.rel (!%p906_p4) target bundleno = 82 (0x52), region = 28 }
  0x45   : > { %s184_s8 = sand.u32 1, %s819_s14  }
  0x46   : > { %s580_s9 = sshll.u32 %s184_s8, 7  ;;  %s185_s10 = scalar_lea.sflag [#allocation3], %s184_s8 }
  0x47   : > { %s188_s11 = scalar_lea.vmem [#allocation8], %s580_s9 }
  0x48   : > { %197 = vsyncadd %s185_s10, 1024  ;;  %s625_s18 = sshll.u32 %s827_s16, 10  ;;  %s211_s19 = sld [smem:[#allocation0]]  }
  0x49   : > { %s204_s5 = scalar_lea.hbm %s1179_s2, %s625_s18  ;;  %s219_s24 = sshll.u32 %s188_s11, 4  ;;  %s220_s24 = int_to_ptr.vmem [resolvable:$true] %s219_s24 }
  0x4a   : > { %s835_s30 = smov 256   ;;  %s836_s4 = smov 512  }
  0x4b   : > { %226 = sst [smem:[#allocation11]] %s835_s30  ;;  %s837_s22 = smov 2  }
  0x4c   : > { %228 = sst [smem:[#allocation11 + $0x1]] %s836_s4  ;;  %s838_s0 = smov 128  }
  0x4d   : > { %230 = sst [smem:[#allocation11 + $0x2]] %s837_s22  ;;  %s839_s9 = smov 8  }
  0x4e   : > { %s583_s7 = sshll.u32 %s211_s19, 26  ;;  %232 = sst [smem:[#allocation11 + $0x3]] %s838_s0 }
  0x4f   : > { %s584_s8 = sadd.s32 134217728, %s583_s7  ;;  %234 = sst [smem:[#allocation11 + $0x4]] %s838_s0 }
  0x50   : > { %236 = sst [smem:[#allocation11 + $0x5]] %s839_s9  ;;  %s840_s1 = smov [#allocation10]  }
  0x51   : > { %238 = dma.general %s204_s5, 1024, %s220_s24, %s185_s10, %s840_s1, [#allocation11], %s584_s8, 0  }
  0x52 PF: > { %244 = sbr.rel (%p935_p0) target bundleno = 131 (0x83), region = 32  ;;  %p1196_p4 = scmp.ne.s32.totalorder (!%p935_p0), %s1188_s23, 0 }
  0x59   : > { %794 = dma.done.wait (%p1196_p4), [#allocation5], 16  }
  0x5a   : > { %796 = vsyncadd (%p1196_p4), [#allocation5], 4294967280 }
  0x5b   : > { %798 = dma.done.wait (%p1196_p4), [#allocation6], 16  }
  0x5c   : > { %800 = vsyncadd (%p1196_p4), [#allocation6], 4294967280  ;;  %s989_s0 = sand.u32 1, %s815_s13   ;;  %p1197_p5 = scmp.ne.s32.totalorder %s1189_s25, 0 }
  0x5d   : > { %s588_s1 = sshll.u32 %s989_s0, 7  ;;  %s255_s29 = scalar_lea.sflag [#allocation3], %s989_s0 }
  0x5e   : > { %s993_s10 = scalar_lea.vmem [#allocation8], %s588_s1 }
  0x5f   : > { %802 = dma.done.wait (%p1197_p5), %s255_s29, 2048  }
  0x60   : > { %804 = vsyncadd (%p1197_p5), %s255_s29, 4294965248 }
  0x61   : > { %263 = sfence }
  0x62   : > { %s999_s11 = sld [smem:[#allocation2]]  ;;  %vm334_vm0 = vcmask 130048   ;;  %s1003_s18 = sld [smem:[#allocation2 + $0x1]]  ;;  %v841_v0 = vmov 0.0   ;;  %v308_v1 = vld [vmem:[%s993_s10] sm:$0xff]  ;;  %v309_v2 = vld [vmem:[%s993_s10 + $0x8] sm:$0xff] }
  0x63   : > { %s1001_s23 = sld [smem:[#allocation7]]  ;;  %s1005_s19 = scalar_lea.vmem [#allocation9], %s588_s1  ;;  %vm420_vm1 = vcmask 261248   ;;  %v592_v3 = vld [vmem:[%s993_s10 + $0x20] sm:$0xff]  ;;  %v593_v4 = vld [vmem:[%s993_s10 + $0x28] sm:$0xff] }
  0x64   : > { %337 = vst.msk [vmem:[%s1005_s19 + $0x10] sm:$0xff] %vm334_vm0, %v841_v0  ;;  %338 = vst.msk [vmem:[%s1005_s19 + $0x18] sm:$0xff] %vm334_vm0, %v841_v0  ;;  %s1031_s25 = sld [smem:[#allocation7 + $0x1]]  ;;  %s1033_s21 = sld [smem:[#allocation2 + $0x2]]  ;;  %v602_v6 = vld [vmem:[%s993_s10 + $0x40] sm:$0xff]  ;;  %v603_v11 = vld [vmem:[%s993_s10 + $0x48] sm:$0xff] }
  0x65   : > { %598 = vst.msk [vmem:[%s1005_s19 + $0x30] sm:$0xff] %vm334_vm0, %v841_v0  ;;  %599 = vst.msk [vmem:[%s1005_s19 + $0x38] sm:$0xff] %vm334_vm0, %v841_v0  ;;  %s1035_s6 = sld [smem:[#allocation7 + $0x2]]  ;;  %s1037_s5 = sld [smem:[#allocation2 + $0x3]]  ;;  %v612_v16 = vld [vmem:[%s993_s10 + $0x60] sm:$0xff]  ;;  %v613_v17 = vld [vmem:[%s993_s10 + $0x68] sm:$0xff] }
  0x66   : > { %608 = vst.msk [vmem:[%s1005_s19 + $0x50] sm:$0xff] %vm334_vm0, %v841_v0  ;;  %609 = vst.msk [vmem:[%s1005_s19 + $0x58] sm:$0xff] %vm334_vm0, %v841_v0  ;;  %s1041_s24 = sld [smem:[#allocation7 + $0x3]]  ;;  %s626_s30 = sshll.u32 %s823_s15, 11 }
  0x67   : > { %618 = vst.msk [vmem:[%s1005_s19 + $0x70] sm:$0xff] %vm334_vm0, %v841_v0  ;;  %619 = vst.msk [vmem:[%s1005_s19 + $0x78] sm:$0xff] %vm334_vm0, %v841_v0  ;;  %s456_s4 = sshll.u32 %s1005_s19, 4  ;;  %s1108_s7 = scalar_lea.hbm %s1180_s3, %s626_s30  ;;  %s1110_s4 = int_to_ptr.vmem [resolvable:$true] %s456_s4 }
  0x68   : > { %423 = vst.msk [vmem:[%s1005_s19 + $0x10] sm:$0xff] %vm420_vm1, %v841_v0  ;;  %424 = vst.msk [vmem:[%s1005_s19 + $0x18] sm:$0xff] %vm420_vm1, %v841_v0  ;;  %v312_v5 = vstv %s999_s11  ;;  %v347_v10 = vstv %s1003_s18  ;;  %s438_s8 = scalar_lea.sflag [#allocation4], %s989_s0  ;;  %s741_s9 = scalar_lea.vmem %s1110_s4, 2048 }
  0x69   : > { %427 = vst.msk [vmem:[%s1005_s19 + $0x30] sm:$0xff] %vm420_vm1, %v841_v0  ;;  %428 = vst.msk [vmem:[%s1005_s19 + $0x38] sm:$0xff] %vm420_vm1, %v841_v0  ;;  %v313_v7 = vsub.f32 %v308_v1, %v312_v5  ;;  %v317_v8 = vstv %s1001_s23  ;;  %v314_v9 = vsub.f32 %v309_v2, %v312_v5  ;;  %v348_v12 = vsub.f32 %v592_v3, %v347_v10  ;;  %p742_p8 = scmp.ne.s32.totalorder %s1110_s4, %s741_s9  ;;  %p1198_p9 = scmp.ne.s32.totalorder %s1190_s26, 0 }
  0x6a   : > { %431 = vst.msk [vmem:[%s1005_s19 + $0x50] sm:$0xff] %vm420_vm1, %v841_v0  ;;  %432 = vst.msk [vmem:[%s1005_s19 + $0x58] sm:$0xff] %vm420_vm1, %v841_v0  ;;  %v352_v13 = vstv %s1031_s25  ;;  %v349_v14 = vsub.f32 %v593_v4, %v347_v10  ;;  %v374_v15 = vstv %s1033_s21  ;;  %s842_s1 = smov [#allocation9]  }
  0x6b   : > { %435 = vst.msk [vmem:[%s1005_s19 + $0x70] sm:$0xff] %vm420_vm1, %v841_v0  ;;  %436 = vst.msk [vmem:[%s1005_s19 + $0x78] sm:$0xff] %vm420_vm1, %v841_v0  ;;  %v318_v18 = vmul.f32 %v317_v8, %v313_v7  ;;  %v319_v19 = vmul.f32 %v317_v8, %v314_v9  ;;  %v375_v20 = vsub.f32 %v602_v6, %v374_v15  ;;  %v379_v21 = vstv %s1035_s6  ;;  %p743_p11 = pnand %p742_p8, %p1198_p9  ;;  %s745_s29 = sshll.u32 %s842_s1, 4  ;;  %s746_s29 = int_to_ptr.vmem [resolvable:$false] %s745_s29 }
  0x6c   : > { %v353_v22 = vmul.f32 %v352_v13, %v348_v12  ;;  %v354_v23 = vmul.f32 %v352_v13, %v349_v14  ;;  %v376_v24 = vsub.f32 %v603_v11, %v374_v15  ;;  %v401_v25 = vstv %s1037_s5  ;;  %s747_s10 = scalar_lea.vmem %s746_s29, 4096  ;;  %p748_p1 = scmp.lt.s32.totalorder %s1110_s4, %s746_s29 }
  0x6d   : > { %335 = vst.msk [vmem:[%s1005_s19] sm:$0xff] %vm334_vm0, %v318_v18  ;;  %336 = vst.msk [vmem:[%s1005_s19 + $0x8] sm:$0xff] %vm334_vm0, %v319_v19  ;;  %v380_v26 = vmul.f32 %v379_v21, %v375_v20  ;;  %v402_v27 = vsub.f32 %v612_v16, %v401_v25  ;;  %v406_v28 = vstv %s1041_s24  ;;  %v403_v29 = vsub.f32 %v613_v17, %v401_v25  ;;  %p744_p0 = pneg %p743_p11  ;;  %p749_p6 = scmp.lt.s32.totalorder %s747_s10, %s741_s9 }
  0x6e   : > { %596 = vst.msk [vmem:[%s1005_s19 + $0x20] sm:$0xff] %vm334_vm0, %v353_v22  ;;  %597 = vst.msk [vmem:[%s1005_s19 + $0x28] sm:$0xff] %vm334_vm0, %v354_v23  ;;  %v381_v30 = vmul.f32 %v379_v21, %v376_v24 }
  0x6f   : > { %421 = vst.msk [vmem:[%s1005_s19] sm:$0xff] %vm420_vm1, %v841_v0  ;;  %422 = vst.msk [vmem:[%s1005_s19 + $0x8] sm:$0xff] %vm420_vm1, %v841_v0  ;;  %v407_v31 = vmul.f32 %v406_v28, %v402_v27  ;;  %v408_v32 = vmul.f32 %v406_v28, %v403_v29  ;;  %p750_p12 = por %p749_p6, %p748_p1 }
  0x70   : > { %606 = vst.msk [vmem:[%s1005_s19 + $0x40] sm:$0xff] %vm334_vm0, %v380_v26  ;;  %607 = vst.msk [vmem:[%s1005_s19 + $0x48] sm:$0xff] %vm334_vm0, %v381_v30 }
  0x71   : > { %425 = vst.msk [vmem:[%s1005_s19 + $0x20] sm:$0xff] %vm420_vm1, %v841_v0  ;;  %426 = vst.msk [vmem:[%s1005_s19 + $0x28] sm:$0xff] %vm420_vm1, %v841_v0  ;;  %p751_p13 = pnand %p750_p12, %p744_p0 }
  0x72   : > { %429 = vst.msk [vmem:[%s1005_s19 + $0x40] sm:$0xff] %vm420_vm1, %v841_v0  ;;  %430 = vst.msk [vmem:[%s1005_s19 + $0x48] sm:$0xff] %vm420_vm1, %v841_v0 }
  0x73   : > { %616 = vst.msk [vmem:[%s1005_s19 + $0x60] sm:$0xff] %vm334_vm0, %v407_v31  ;;  %617 = vst.msk [vmem:[%s1005_s19 + $0x68] sm:$0xff] %vm334_vm0, %v408_v32 }
  0x74   : > { %433 = vst.msk [vmem:[%s1005_s19 + $0x60] sm:$0xff] %vm420_vm1, %v841_v0  ;;  %434 = vst.msk [vmem:[%s1005_s19 + $0x68] sm:$0xff] %vm420_vm1, %v841_v0 }
  0x75   : > { %754 = shalt.err (!%p751_p13)
}
  0x76   : > { %s755_s11 = scalar_lea.hbm %s1108_s7, 2048  ;;  %s759_s19 = scalar_lea.hbm %s1180_s3, 4096 }
  0x77   : > { %p756_p2 = scmp.ne.s32.totalorder %s1108_s7, %s755_s11  ;;  %p760_p4 = scmp.lt.u32.totalorder %s1108_s7, %s1180_s3 }
  0x78   : > { %p761_p5 = scmp.lt.u32.totalorder %s759_s19, %s755_s11  ;;  %p763_p11 = scmp.lt.u32.totalorder %s755_s11, %s1108_s7 }
  0x79   : > { %p757_p3 = pnand %p756_p2, %p1198_p9 }
  0x7a   : > { %p762_p8 = por %p761_p5, %p760_p4 }
  0x7b   : > { %p758_p7 = pneg %p757_p3 }
  0x7c   : > { %p764_p0 = por %p763_p11, %p762_p8 }
  0x7e   : > { %p765_p1 = pnand %p764_p0, %p758_p7 }
  0x80   : > { %768 = shalt.err (!%p765_p1)
}
  0x81   : > { %s843_s6 = smov 128   ;;  %s844_s5 = smov 8  }
  0x82   : > { %636 = dma.vmem_to_hbm [thread:$0]  (%p1198_p9), %s1110_s4, 2048, %s1108_s7, %s438_s8, %s843_s6, %s843_s6, %s844_s5  }
  0x83 PF: > { %s471_s24 = sand.u32 1, %s811_s12   ;;  %p1199_p6 = scmp.ne.s32.totalorder %s1191_s28, 0 }
  0x84   : > { %s472_s30 = scalar_lea.sflag [#allocation4], %s471_s24 }
  0x85   : > { %p646_p12 = pnand %p579_p10, %p1199_p6 }
  0x87   : > { %806 = dma.done.wait (!%p646_p12), %s472_s30, 2048  }
  0x88   : > { %808 = vsyncadd (!%p646_p12), %s472_s30, 4294965248  ;;  %s21_s17 = sadd.s32 1, %s831_s17   ;;  %s1200_s12 = smov %s815_s13 }
  0x89   : > { %p18_p13 = scmp.ge.s32.totalorder %s21_s17, 4   ;;  %s1201_s13 = smov %s819_s14 }
  0x8a   : > { %s1202_s14 = smov %s927_s27  ;;  %s1203_s15 = smov %s827_s16 }
  0x8b   : > { %s1204_s16 = smov %s1206_s20  ;;  %20 = sbr.rel (!%p18_p13) target bundleno = 11 (0xb), region = 98 }
  0x92   :  { %477 = vsyncpa [#allocation3], 1 }
  0x93   :  { %479 = vsyncpa [#allocation3 + $0x1], 1 }
  0x94   :  { %480 = vsyncpa [#allocation4], 1 }
  0x95   :  { %482 = vsyncpa [#allocation4 + $0x1], 1 }
  0x96   :  { %483 = vsyncpa [#allocation5], 1 }
  0x97   :  { %485 = vsyncpa [#allocation5 + $0x1], 1 }
  0x98   :  { %486 = vsyncpa [#allocation6], 1 }
  0x99   :  { %488 = vsyncpa [#allocation6 + $0x1], 1 }

</bundles_post_ra>
